<compile_context>
chip_gen: v5e
topology: v5e:2x2
jax: 0.10.0
libtpu: 0.0.40
codegen_flags: <defaults>
</compile_context>

<pallas_src>
import jax
import jax.numpy as jnp
from jax.experimental import pallas as pl
from jax.experimental.pallas import tpu as pltpu


def _reinforce_kernel(x_ref, p1_ref, p2_ref, out_ref):
    # x_ref : [n_obs+1, tb]        last row is the constant-1 "bias" row
    # p1_ref: [hidden+1, n_obs+1]  last row = [0,...,0,1] -> h's last row is 1
    # p2_ref: [n_actions, hidden+1]
    x = x_ref[...]
    p1 = p1_ref[...]
    p2 = p2_ref[...]

    # fc1 + ReLU; batch on lanes -> dense MXU output N = tb.
    h = jnp.dot(p1, x, preferred_element_type=jnp.float32)        # [hidden+1, tb]
    h = jnp.maximum(h, 0.0)

    # output layer (second bias rides on h's constant-1 last row)
    logits = jnp.dot(p2, h, preferred_element_type=jnp.float32)   # [n_actions, tb]

    # TODO(synk): nn.Dropout is identity in eval mode; training-mode random
    # masking is intentionally not implemented.

    # numerically-stable softmax over the action axis (sublane axis here)
    logits = logits - jnp.max(logits, axis=0, keepdims=True)
    e = jnp.exp(logits)
    denom = jnp.sum(e, axis=0, keepdims=True)                     # [1, tb]
    probs = e / denom                                             # exact: rows sum to 1

    # Fused guard: any NaN/Inf in the logits poisons that column's denom, so a
    # finiteness check on the [1, tb] denom covers the tile.  Zero total mass
    # is unreachable after max-subtraction (denom >= 1 for finite logits).
    # TODO(synk): guard is per-tile; PyTorch's check is global over the batch
    # (exact match whenever the batch is a single tile, i.e. B <= 512 here).
    nonfinite = 1.0 - jnp.isfinite(denom).astype(jnp.float32)
    bad = jnp.max(nonfinite)                                      # scalar, 1.0 if bad
    uniform = jnp.full_like(probs, 1.0 / probs.shape[0])
    out_ref[...] = jnp.where(
        jnp.broadcast_to(bad, probs.shape) > 0.0, uniform, probs
    ).astype(out_ref.dtype)


def pack_params(w1, b1, w2, b2):
    """Fold both biases into transposed weight matrices.

    p1 = [[w1^T, b1], [0...0, 1]] : [hidden+1, n_obs+1].  Applied to the
    augmented input [x, 1], its last output row is identically 1 and survives
    ReLU, so p2 = [w2^T | b2] : [n_actions, hidden+1] folds the second bias.
    """
    n_obs, hidden = w1.shape
    _, n_actions = w2.shape
    p1 = jnp.zeros((hidden + 1, n_obs + 1), jnp.float32)
    p1 = p1.at[:hidden, :n_obs].set(w1.T.astype(jnp.float32))
    p1 = p1.at[:hidden, n_obs].set(b1.astype(jnp.float32))
    p1 = p1.at[hidden, n_obs].set(1.0)
    p2 = jnp.concatenate(
        [w2.T.astype(jnp.float32), b2.reshape(-1, 1).astype(jnp.float32)],
        axis=1)
    return p1, p2


def _round_up(x, m):
    return ((x + m - 1) // m) * m


def _pick_tile_b(batch, max_tile_b=2048, single_tile_max=512):
    """Whole batch in one tile when small; otherwise large lane-aligned tiles
    with at least 2 grid steps so v7x megacore can shard the parallel axis."""
    if batch <= single_tile_max:
        return batch
    return min(max_tile_b, _round_up(pl.cdiv(batch, 2), 128))


def mc_reinforce_forward(x, p1, p2, *, max_tile_b=2048, single_tile_max=512):
    """x: [B, n_obs] f32; p1: [hidden+1, n_obs+1]; p2: [n_actions, hidden+1].
    Returns probs: [B, n_actions] f32."""
    B, n_obs = x.shape
    hidden_p1, n_obs_p1 = p1.shape
    n_actions, hidden_p1_b = p2.shape
    assert n_obs_p1 == n_obs + 1 and hidden_p1_b == hidden_p1

    tb = _pick_tile_b(B, max_tile_b, single_tile_max)
    b_pad = _round_up(B, tb)
    grid = (b_pad // tb,)

    # Wrapper-side layout plumbing: augment with the constant-1 column, pad the
    # batch to a whole number of tiles (zero padding stays finite so the
    # in-kernel guard is untouched), and transpose so batch lands on lanes.
    x_aug = jnp.concatenate(
        [x.astype(jnp.float32), jnp.ones((B, 1), jnp.float32)], axis=1)
    if b_pad != B:
        x_aug = jnp.pad(x_aug, ((0, b_pad - B), (0, 0)))
    xT = x_aug.T                                       # [n_obs+1, b_pad]

    flops = int(2 * b_pad * ((n_obs + 1) * hidden_p1 + hidden_p1 * n_actions))
    bytes_accessed = int(4 * (xT.size + p1.size + p2.size + n_actions * b_pad))

    probsT = pl.pallas_call(
        _reinforce_kernel,
        out_shape=jax.ShapeDtypeStruct((n_actions, b_pad), jnp.float32),
        grid=grid,
        in_specs=[
            pl.BlockSpec((n_obs + 1, tb), lambda i: (0, i)),
            pl.BlockSpec((hidden_p1, n_obs + 1), lambda i: (0, 0)),
            pl.BlockSpec((n_actions, hidden_p1), lambda i: (0, 0)),
        ],
        out_specs=pl.BlockSpec((n_actions, tb), lambda i: (0, i)),
        compiler_params=pltpu.CompilerParams(
            dimension_semantics=("parallel",)),
        cost_estimate=pl.CostEstimate(
            flops=flops,
            transcendentals=int(b_pad * n_actions),
            bytes_accessed=bytes_accessed),
    )(xT, p1, p2)

    return probsT.T[:B]                                # back to [B, n_actions]


def init_params(key, n_observations, hidden_size, n_actions):
    """Deterministic init mimicking torch.nn.Linear (uniform +/- 1/sqrt(fan_in))."""
    k1, k2, k3, k4 = jax.random.split(key, 4)
    bound1 = 1.0 / jnp.sqrt(n_observations)
    bound2 = 1.0 / jnp.sqrt(hidden_size)
    w1 = jax.random.uniform(k1, (n_observations, hidden_size), jnp.float32,
                            -bound1, bound1)
    b1 = jax.random.uniform(k2, (hidden_size,), jnp.float32, -bound1, bound1)
    w2 = jax.random.uniform(k3, (hidden_size, n_actions), jnp.float32,
                            -bound2, bound2)
    b2 = jax.random.uniform(k4, (n_actions,), jnp.float32, -bound2, bound2)
    return w1, b1, w2, b2


def _reference(x, w1, b1, w2, b2):
    h = jnp.maximum(x @ w1 + b1, 0.0)
    logits = h @ w2 + b2
    logits = logits - jnp.max(logits, axis=-1, keepdims=True)
    return jax.nn.softmax(logits, axis=-1)


if __name__ == "__main__":
    # CartPole-like sizes: 4 observations, 32 hidden, 2 actions, batch 8.
    B, n_obs, hidden, n_actions = 8, 4, 32, 2
    key = jax.random.PRNGKey(0)
    kx, kp, kx2 = jax.random.split(key, 3)
    x = jax.random.normal(kx, (B, n_obs), dtype=jnp.float32)
    w1, b1, w2, b2 = init_params(kp, n_obs, hidden, n_actions)
    p1, p2 = pack_params(w1, b1, w2, b2)

    # single-tile path
    probs = jax.block_until_ready(mc_reinforce_forward(x, p1, p2))
    assert probs.shape == (B, n_actions)
    assert jnp.allclose(jnp.sum(probs, axis=-1), 1.0, atol=1e-5)
    ref = _reference(x, w1, b1, w2, b2)
    assert jnp.allclose(probs, ref, atol=2e-3)

    # multi-tile path (B > 512 -> 2 grid steps, batch padded to tile multiple)
    B2 = 1000
    x2 = jax.random.normal(kx2, (B2, n_obs), dtype=jnp.float32)
    probs2 = jax.block_until_ready(mc_reinforce_forward(x2, p1, p2))
    assert probs2.shape == (B2, n_actions)
    assert jnp.allclose(jnp.sum(probs2, axis=-1), 1.0, atol=1e-5)
    ref2 = _reference(x2, w1, b1, w2, b2)
    assert jnp.allclose(probs2, ref2, atol=2e-3)

    print("KERNEL_OK")
</pallas_src>

<mosaic_0001>
module attributes {stable_mosaic.version = 11 : i64} {
  func.func @_reinforce_kernel(%arg0: i32, %arg1: memref<5x8xf32, #tpu.memory_space<vmem>>, %arg2: memref<33x5xf32, #tpu.memory_space<vmem>>, %arg3: memref<2x33xf32, #tpu.memory_space<vmem>>, %arg4: memref<2x8xf32, #tpu.memory_space<vmem>>) attributes {dimension_semantics = [#tpu.dimension_semantics<parallel>], iteration_bounds = array<i64: 1>, scalar_prefetch = 0 : i64, scratch_operands = 0 : i64, tpu.core_type = #tpu.core_type<tc>, window_params = [{transform_indices = @transform_0, window_bounds = array<i64: 5, 8>}, {pipeline_mode = #tpu.pipeline_mode<synchronous>, transform_indices = @transform_1, window_bounds = array<i64: 33, 5>}, {pipeline_mode = #tpu.pipeline_mode<synchronous>, transform_indices = @transform_2, window_bounds = array<i64: 2, 33>}, {transform_indices = @transform_3, window_bounds = array<i64: 2, 8>}]} {
    %c0 = arith.constant 0 : index
    %c0_0 = arith.constant 0 : index
    %0 = vector.load %arg1[%c0, %c0_0] : memref<5x8xf32, #tpu.memory_space<vmem>>, vector<5x8xf32>
    %c0_1 = arith.constant 0 : index
    %c0_2 = arith.constant 0 : index
    %1 = vector.load %arg2[%c0_1, %c0_2] : memref<33x5xf32, #tpu.memory_space<vmem>>, vector<33x5xf32>
    %c0_3 = arith.constant 0 : index
    %c0_4 = arith.constant 0 : index
    %2 = vector.load %arg3[%c0_3, %c0_4] : memref<2x33xf32, #tpu.memory_space<vmem>>, vector<2x33xf32>
    %cst = arith.constant dense<0.000000e+00> : vector<33x8xf32>
    %3 = tpu.matmul %1, %0, %cst {dimension_numbers = #tpu.dot_dimension_numbers<[1], [0], [0], [1], [0, 0, 1, 1], [], []>} : vector<33x5xf32>, vector<5x8xf32>, vector<33x8xf32> -> vector<33x8xf32>
    %cst_5 = arith.constant 0.000000e+00 : f32
    %4 = vector.broadcast %cst_5 : f32 to vector<33x8xf32>
    %5 = arith.maximumf %3, %4 : vector<33x8xf32>
    %cst_6 = arith.constant dense<0.000000e+00> : vector<2x8xf32>
    %6 = tpu.matmul %2, %5, %cst_6 {dimension_numbers = #tpu.dot_dimension_numbers<[1], [0], [0], [1], [0, 0, 1, 1], [], []>} : vector<2x33xf32>, vector<33x8xf32>, vector<2x8xf32> -> vector<2x8xf32>
    %cst_7 = arith.constant dense<0xFF800000> : vector<8xf32>
    %7 = vector.multi_reduction <maximumf>, %6, %cst_7 [0] : vector<2x8xf32> to vector<8xf32>
    %8 = vector.shape_cast %7 : vector<8xf32> to vector<1x8xf32>
    %9 = vector.broadcast %8 : vector<1x8xf32> to vector<2x8xf32>
    %10 = arith.subf %6, %9 : vector<2x8xf32>
    %11 = math.exp %10 : vector<2x8xf32>
    %cst_8 = arith.constant dense<0.000000e+00> : vector<8xf32>
    %12 = vector.multi_reduction <add>, %11, %cst_8 [0] : vector<2x8xf32> to vector<8xf32>
    %13 = vector.shape_cast %12 : vector<8xf32> to vector<1x8xf32>
    %14 = vector.broadcast %13 : vector<1x8xf32> to vector<2x8xf32>
    %15 = arith.divf %11, %14 : vector<2x8xf32>
    %16 = tpu.weird %13 : vector<1x8xf32> -> vector<1x8xi1>
    %cst_9 = arith.constant dense<true> : vector<1x8xi1>
    %17 = arith.xori %16, %cst_9 : vector<1x8xi1>
    %18 = arith.extui %17 : vector<1x8xi1> to vector<1x8xi32>
    %19 = arith.sitofp %18 : vector<1x8xi32> to vector<1x8xf32>
    %cst_10 = arith.constant 1.000000e+00 : f32
    %20 = vector.broadcast %cst_10 : f32 to vector<1x8xf32>
    %21 = arith.subf %20, %19 : vector<1x8xf32>
    %22 = vector.shape_cast %21 : vector<1x8xf32> to vector<1x1x8xf32>
    %cst_11 = arith.constant dense<0xFF800000> : vector<1xf32>
    %23 = vector.multi_reduction <maximumf>, %22, %cst_11 [1, 2] : vector<1x1x8xf32> to vector<1xf32>
    %24 = vector.shape_cast %23 : vector<1xf32> to vector<1x1x1xf32>
    %25 = vector.extract %24[0, 0, 0] : f32 from vector<1x1x1xf32>
    %cst_12 = arith.constant 5.000000e-01 : f32
    %26 = vector.broadcast %cst_12 : f32 to vector<2x8xf32>
    %27 = vector.broadcast %25 : f32 to vector<2x8xf32>
    %cst_13 = arith.constant 0.000000e+00 : f32
    %28 = vector.broadcast %cst_13 : f32 to vector<2x8xf32>
    %29 = arith.cmpf ogt, %27, %28 : vector<2x8xf32>
    %30 = arith.select %29, %26, %15 : vector<2x8xi1>, vector<2x8xf32>
    %c0_14 = arith.constant 0 : index
    %c0_15 = arith.constant 0 : index
    %31 = vector.load %arg4[%c0_14, %c0_15] : memref<2x8xf32, #tpu.memory_space<vmem>>, vector<2x8xf32>
    tpu.vector_store %arg4[%c0_14, %c0_15], %30 {strides = array<i32>} : memref<2x8xf32, #tpu.memory_space<vmem>>, vector<2x8xf32>,
    return
  }
  func.func @transform_0(%arg0: i32) -> (i32, i32) {
    %c0_i32 = arith.constant 0 : i32
    %c0_i32_0 = arith.constant 0 : i32
    return %c0_i32, %arg0 : i32, i32
  }
  func.func @transform_1(%arg0: i32) -> (i32, i32) {
    %c0_i32 = arith.constant 0 : i32
    %c0_i32_0 = arith.constant 0 : i32
    %c0_i32_1 = arith.constant 0 : i32
    return %c0_i32, %c0_i32_0 : i32, i32
  }
  func.func @transform_2(%arg0: i32) -> (i32, i32) {
    %c0_i32 = arith.constant 0 : i32
    %c0_i32_0 = arith.constant 0 : i32
    %c0_i32_1 = arith.constant 0 : i32
    return %c0_i32, %c0_i32_0 : i32, i32
  }
  func.func @transform_3(%arg0: i32) -> (i32, i32) {
    %c0_i32 = arith.constant 0 : i32
    %c0_i32_0 = arith.constant 0 : i32
    return %c0_i32, %arg0 : i32, i32
  }
}

</mosaic_0001>

<bundles_post_ra>
// kernel: tpu_custom_call.1
= control target key start
LH: loop header
LB: loop body
LE: loop exit
PB: predicated region body
PF: predicated region fallthrough
CT: control target
= control target key end

     0   :  { %vm38_vm0 = vcmask 1044480   ;;  %vm22_vm1 = vcmask 39936   ;;  %s266_s0 = inlined_call_operand.vmem [shape: f32[5,8], index: 0, kind: input, shape index: {}]   ;;  %s267_s1 = inlined_call_operand.vmem [shape: f32[33,5], index: 1, kind: input, shape index: {}]   ;;  %s268_s2 = inlined_call_operand.vmem [shape: f32[2,33], index: 2, kind: input, shape index: {}]   ;;  %s269_s3 = inlined_call_operand.hbm [shape: f32[2,8], index: 3, kind: output, shape index: {}]  }
   0x1   :  { %v15_v0 = vld [vmem:[%s266_s0] sm:$0x1f]  ;;  %v19_v1 = vld [vmem:[%s267_s1 + $0x18] sm:$0xff]  ;;  %v18_v3 = vld [vmem:[%s267_s1 + $0x10] sm:$0xff] }
   0x2   :  { %v16_v2 = vld [vmem:[%s267_s1] sm:$0xff]  ;;  %180 = vmatpush.msk.msra.mxu3 %vm38_vm0, %v15_v0  ;;  %170 = vmatpush.msk.msra.mxu0 %vm38_vm0, %v15_v0 }
   0x3   :  { %174 = vmatmul.msk.f32.vlgmr.msra.gmra.mxu3 %vm22_vm1, %v19_v1  ;;  %179 = vmatpush.msk.msra.mxu2 %vm38_vm0, %v15_v0 }
   0x4   :  { %8 = vsyncpa [#allocation3], 0  ;;  %171 = vmatmul.msk.f32.vlgmr.msra.gmra.mxu0 %vm22_vm1, %v16_v2  ;;  %173 = vmatmul.msk.f32.vlgmr.msra.gmra.mxu2 %vm22_vm1, %v18_v3  ;;  %v20_v4 = vld [vmem:[%s267_s1 + $0x20] sm:$0x1]  ;;  %v17_v5 = vld [vmem:[%s267_s1 + $0x8] sm:$0xff]  ;;  %vm83_vm2 = vcmask 1040384  }
   0x5   :  { %v21_v16 = vld [vmem:[%s268_s2] sm:$0x3]  ;;  %vm79_vm3 = vcmask 269312   ;;  %vm107_vm4 = vcmask 58368   ;;  %vm216_vm6 = vmmov 1   ;;  %v217_v35 = vmov 0.0  }
   0x6   :  { %vm145_vm8 = vcmask 64512   ;;  %s218_s1 = smov [#allocation2]   ;;  %s161_s27 = sshll.u32 %s269_s3, 4  ;;  %s162_s27 = int_to_ptr.hbm [resolvable:$true] %s161_s27 }
   0x7   :  { %s159_s2 = sshll.u32 %s218_s1, 4  ;;  %s160_s2 = int_to_ptr.vmem [resolvable:$true] %s159_s2 }
   0xb   :  { %175 = vmatmul.msk.f32.gmra.mxu3 %vm22_vm1, %v20_v4 }
   0xc   :  { %172 = vmatmul.msk.f32.gmra.mxu0 %vm22_vm1, %v17_v5 }
  0x81   :  { %v59_v7 = vpop.f32.mrf.mxu0 }
  0x82   :  { %v74_v15 = vmax.f32 %v59_v7, 0.0 }
  0x86   :  { %v68_v6 = vpop.f32.mrf.mxu3 }
  0x87   :  { %v65_v9 = vpop.f32.mrf.mxu2  ;;  %v77_v12 = vmax.f32 %v68_v6, 0.0 }
  0x88   :  { %v76_v13 = vmax.f32 %v65_v9, 0.0 }
  0x89   :  { %v62_v11 = vpop.f32.mrf.mxu0 }
  0x8a   :  { %v75_v14 = vmax.f32 %v62_v11, 0.0 }
  0x8e   :  { %v71_v8 = vpop.f32.mrf.mxu3 }
  0x8f   :  { %v78_v10 = vmax.f32 %v71_v8, 0.0 }
  0x91   :  { %176 = vmatpush.msk.msra.mxu1 %vm83_vm2, %v78_v10 }
  0x93   :  { %99 = vmatpush.msra.mxu1 %v77_v12 }
  0x95   :  { %100 = vmatpush.msra.mxu1 %v76_v13 }
  0x97   :  { %101 = vmatpush.msra.mxu1 %v75_v14 }
  0x99   :  { %102 = vmatpush.msra.mxu1 %v74_v15 }
  0x9a   :  { %177 = vmatmul.msk.f32.vlgmr.msra.gmra.mxu1 %vm79_vm3, %v21_v16 }
 0x117   :  { %v104_v17 = vpop.f32.mrf.mxu1 }
 0x118   :  { %v108_v18 = vsel %vm107_vm4, %v104_v17, -inf }
 0x119   :  { %v109_v19 = vrot.slane %v108_v18, 4 }
 0x11b   :  { %v110_v20 = vmax.f32 %v108_v18, %v109_v19 }
 0x11d   :  { %v111_v21 = vrot.slane %v110_v20, 2 }
 0x11f   :  { %v112_v22 = vmax.f32 %v110_v20, %v111_v21 }
 0x121   :  { %v113_v23 = vrot.slane %v112_v22, 1 }
 0x123   :  { %v114_v24 = vmax.f32 %v112_v22, %v113_v23 }
 0x125   :  { %v115_v25 = vsub.f32 %v104_v17, %v114_v24 }
 0x127   :  { %v116_v26 = vmul.f32 1.442695, %v115_v25 }
 0x129   :  { %186 = vpow2.f32 %v116_v26 }
 0x12f   :  { %v187_v27 = vpop.eup %186 }
 0x130   :  { %v118_v28 = vsel %vm107_vm4, %v187_v27, 0.0 }
 0x131   :  { %v119_v29 = vrot.slane %v118_v28, 4 }
 0x133   :  { %v120_v30 = vadd.f32 %v119_v29, %v118_v28 }
 0x135   :  { %v121_v31 = vrot.slane %v120_v30, 2 }
 0x137   :  { %v122_v32 = vadd.f32 %v121_v31, %v120_v30 }
 0x139   :  { %v123_v33 = vrot.slane %v122_v32, 1 }
 0x13b   :  { %v124_v34 = vadd.f32 %v123_v33, %v122_v32 }
 0x13d   :  { %188 = vrcp.f32 %v124_v34  ;;  %vm130_vm5 = vweird.f32 %v124_v34  ;;  %v136_v42 = vand.u32 2147483648, %v124_v34  ;;  %v134_v44 = vand.u32 2147483647, %v124_v34 }
 0x13e   :  { %vm141_vm7 = vmxor %vm130_vm5, %vm216_vm6 }
 0x13f   :  { %v178_v36 = vsel %vm141_vm7, 1.0, %v217_v35  ;;  %v137_v46 = vor.u32 1.1754944e-38, %v136_v42  ;;  %vm135_vm11 = vcmp.eq.f32.partialorder %v134_v44, 8.507059e+37 }
 0x140   :  { %v144_v37 = vsub.f32 1.0, %v178_v36 }
 0x142   :  { %v146_v38 = vsel %vm145_vm8, %v144_v37, -inf }
 0x143   :  { %v189_v39 = vpop.eup %188  ;;  %147 = vmax.xlane.f32.xlu0 %v146_v38 }
 0x144   :  { %vm131_vm9 = vweird.f32 %v189_v39  ;;  %v126_v40 = vmul.f32 %v189_v39, %v124_v34 }
 0x145   :  { %vm132_vm10 = vmor %vm130_vm5, %vm131_vm9 }
 0x146   :  { %v127_v41 = vsub.f32 1.0, %v126_v40 }
 0x148   :  { %v128_v43 = vmul.f32 %v189_v39, %v127_v41 }
 0x14a   :  { %v129_v45 = vadd.f32 %v189_v39, %v128_v43 }
 0x14c   :  { %v133_v47 = vsel %vm132_vm10, %v189_v39, %v129_v45 }
 0x14d   :  { %v138_v48 = vsel %vm135_vm11, %v137_v46, %v133_v47 }
 0x14e   :  { %v139_v49 = vmul.f32 %v187_v27, %v138_v48 }
 0x1b6   :  { %v148_v50 = vpop.xlane.xlu0 %147 }
 0x1b7   :  { %181 = vpush %v148_v50 }
 0x1e8   :  { %s182_s28 = spop %181 }
 0x1e9   :  { %v150_v51 = vstv %s182_s28 }
 0x1ea   :  { %vm151_vm12 = vcmp.gt.f32.partialorder %v150_v51, 0.0 }
 0x1eb   :  { %v152_v52 = vsel %vm151_vm12, 0.5, %v139_v49 }
 0x1ec   :  { %153 = vst.msk [vmem:[#allocation2] sm:$0x3] %vm107_vm4, %v152_v52 }
 0x1ed   :  { %164 = dma.vmem_to_hbm [thread:$0]  %s160_s2, 32, %s162_s27, [#allocation3]  }
 0x1ee   :  { %214 = dma.done.wait [#allocation3], 32  }
 0x1ef   :  { %215 = vsyncadd [#allocation3], 4294967264 }
 0x1f0   :  { %169 = vsyncpa [#allocation3], 1 }

</bundles_post_ra>
